<compile_context>
chip_gen: v7x
topology: tpu7x:2x2x1
jax: 0.10.0
libtpu: 0.0.40
codegen_flags: <defaults>
</compile_context>

<pallas_src>
import functools

import jax
import jax.numpy as jnp
from jax import lax
from jax.experimental import pallas as pl
from jax.experimental.pallas import tpu as pltpu


def _conv1d_leakyrelu_kernel(x_ref, w_ref, o_ref, *, kernel_size, negative_slope):
    # x_ref: (bn, C_in, L)   w_ref: (K, C_out, C_in)   o_ref: (bn, C_out, L_out)
    bn = x_ref.shape[0]
    l_out = o_ref.shape[2]

    def one_batch(b, carry):
        x_b = x_ref[b]                                    # (C_in, L): full-L, lane-aligned load
        # Tap 0 at lane offset 0; taps 1..K-1 are full-L matmuls whose (C_out, L)
        # output is shift-added at lane offset k.  No im2col copy of x is built.
        acc = jnp.dot(w_ref[0], x_b,
                      preferred_element_type=jnp.float32)[:, :l_out]
        for k in range(1, kernel_size):                   # K is a tiny, static tap count
            y = jnp.dot(w_ref[k], x_b, preferred_element_type=jnp.float32)
            acc = acc + y[:, k:k + l_out]                 # shift-and-add (== roll(y,-k)[:, :l_out])
        # LeakyReLU(slope): max(y, slope*y) -> 2 VPU ops, no compare/select.
        acc = jnp.maximum(acc, negative_slope * acc)
        o_ref[b] = acc.astype(o_ref.dtype)
        return carry

    if bn == 1:
        one_batch(0, 0)                                   # skip loop machinery for fold == 1
    else:
        # Batch fold via fori_loop(unroll=True): live ranges stay bounded (no static
        # Python unroll) while the LLO scheduler still sees the whole body.
        lax.fori_loop(0, bn, one_batch, 0, unroll=True)


def _choose_batch_fold(n, c_in, c_out, l, l_out, k, itemsize, max_fold,
                       block_budget_bytes):
    """Pick how many batches to fold per grid step (double-buffer-aware)."""
    def vmem_need(bn):
        x_blk = bn * c_in * l * itemsize
        o_blk = bn * c_out * l_out * itemsize
        w_blk = k * c_out * c_in * itemsize
        # Pallas double-buffers the streamed x and output blocks; the weight has a
        # constant index_map but is budgeted 2x to stay conservative.
        pipelined = 2 * (x_blk + o_blk + w_blk)
        # In-kernel f32 temporaries per batch step (tap output, shifted view, acc).
        temps = 3 * c_out * l * 4
        return pipelined + temps

    bn = 1
    for cand in range(2, min(n, max_fold) + 1):           # need() is monotone in bn
        if vmem_need(cand) <= block_budget_bytes:
            bn = cand
    # v7x megacore: keep >= 2 grid steps so the "parallel" batch axis can be sharded
    # across both TensorCores (no-op on single-TC v5e/v6e).
    if n >= 2:
        bn = min(bn, pl.cdiv(n, 2))
    bn = max(1, min(bn, n))
    # Prefer a fold that divides N (no padded-garbage tail block) unless that would
    # shrink the block by more than 2x.
    div = max(d for d in range(1, bn + 1) if n % d == 0)
    if 2 * div >= bn:
        bn = div
    return bn, vmem_need(bn)


def basic_conv1d(x_ncl, weight, *, negative_slope=0.01, compute_dtype=None,
                 max_batch_fold=32, block_budget_bytes=16 << 20):
    """BasicConv1d forward: Conv1d(bias=False, stride=1, padding=0) + LeakyReLU.

    x_ncl:  (N, C_in, L)      -- PyTorch NCL layout (kept end-to-end)
    weight: (C_out, C_in, K)  -- PyTorch Conv1d weight layout
    returns (N, C_out, L_out) with L_out = L - K + 1
    """
    n, c_in, l = x_ncl.shape
    c_out, c_in_w, k = weight.shape
    assert c_in == c_in_w, "in_channels mismatch"
    l_out = l - k + 1
    assert l_out >= 1, "kernel_size larger than input length"

    out_dtype = x_ncl.dtype
    # Weight as (K, C_out, C_in): one (C_out, C_in) MXU operand per tap.
    w_taps = jnp.transpose(weight, (2, 0, 1))
    if compute_dtype is not None:                 # e.g. jnp.bfloat16 for v5e/v6e/v7x MXU
        x_ncl = x_ncl.astype(compute_dtype)
        w_taps = w_taps.astype(compute_dtype)

    itemsize = jnp.dtype(x_ncl.dtype).itemsize
    bn, vmem_need = _choose_batch_fold(
        n, c_in, c_out, l, l_out, k, itemsize, max_batch_fold, block_budget_bytes)
    grid_b = pl.cdiv(n, bn)

    kernel = functools.partial(
        _conv1d_leakyrelu_kernel, kernel_size=k, negative_slope=negative_slope)

    flops = 2 * n * l_out * c_out * c_in * k
    bytes_accessed = ((x_ncl.size + w_taps.size) * itemsize
                      + n * c_out * l_out * jnp.dtype(out_dtype).itemsize)

    return pl.pallas_call(
        kernel,
        out_shape=jax.ShapeDtypeStruct((n, c_out, l_out), out_dtype),
        grid_spec=pltpu.PrefetchScalarGridSpec(
            num_scalar_prefetch=0,
            grid=(grid_b,),
            in_specs=[
                pl.BlockSpec((bn, c_in, l), lambda i: (i, 0, 0)),
                pl.BlockSpec((k, c_out, c_in), lambda i: (0, 0, 0)),
            ],
            out_specs=pl.BlockSpec((bn, c_out, l_out), lambda i: (i, 0, 0)),
        ),
        compiler_params=pltpu.CompilerParams(
            dimension_semantics=("parallel",),
            # Computed double-buffered working set + headroom; capped at 64 MiB so
            # the same setting is safe on v7x (64 MiB physical VMEM).
            vmem_limit_bytes=int(min(max(2 * vmem_need, 32 << 20), 64 << 20)),
        ),
        cost_estimate=pl.CostEstimate(
            flops=flops, transcendentals=0, bytes_accessed=bytes_accessed),
    )(x_ncl, w_taps)


def _reference(x_ncl, weight, negative_slope=0.01):
    # Pure-JAX reference (NCL conv, VALID padding, stride 1) + LeakyReLU.
    y = lax.conv_general_dilated(
        x_ncl, weight,
        window_strides=(1,),
        padding="VALID",
        dimension_numbers=("NCH", "OIH", "NCH"),
    )
    return jnp.where(y > 0, y, negative_slope * y)


if __name__ == "__main__":
    key = jax.random.PRNGKey(0)
    kx, kw = jax.random.split(key)

    # Shapes consistent with BasicConv1d(in_channels=4, out_channels=8, kernel_size=3).
    batch, in_channels, out_channels, length, ksize = 2, 4, 8, 16, 3

    x = jax.random.normal(kx, (batch, in_channels, length), dtype=jnp.float32)
    w = jax.random.normal(kw, (out_channels, in_channels, ksize), dtype=jnp.float32) * 0.1

    out = basic_conv1d(x, w)
    out = jax.block_until_ready(out)

    ref = _reference(x, w)
    assert out.shape == (batch, out_channels, length - ksize + 1)
    assert jnp.allclose(out, ref, atol=1e-5, rtol=1e-5)

    print("KERNEL_OK")
</pallas_src>

<mosaic_0001>
module attributes {stable_mosaic.version = 11 : i64} {
  func.func @_conv1d_leakyrelu_kernel(%arg0: i32, %arg1: memref<1x4x16xf32, #tpu.memory_space<vmem>>, %arg2: memref<3x8x4xf32, #tpu.memory_space<vmem>>, %arg3: memref<1x8x14xf32, #tpu.memory_space<vmem>>) attributes {dimension_semantics = [#tpu.dimension_semantics<parallel>], iteration_bounds = array<i64: 2>, scalar_prefetch = 0 : i64, scratch_operands = 0 : i64, tpu.core_type = #tpu.core_type<tc>, window_params = [{transform_indices = @transform_0, window_bounds = array<i64: 1, 4, 16>}, {pipeline_mode = #tpu.pipeline_mode<synchronous>, transform_indices = @transform_1, window_bounds = array<i64: 3, 8, 4>}, {transform_indices = @transform_2, window_bounds = array<i64: 1, 8, 14>}]} {
    %c0 = arith.constant 0 : index
    %c0_0 = arith.constant 0 : index
    %c0_1 = arith.constant 0 : index
    %0 = vector.load %arg1[%c0, %c0_0, %c0_1] : memref<1x4x16xf32, #tpu.memory_space<vmem>>, vector<1x4x16xf32>
    %1 = vector.shape_cast %0 : vector<1x4x16xf32> to vector<4x16xf32>
    %c0_2 = arith.constant 0 : index
    %c0_3 = arith.constant 0 : index
    %c0_4 = arith.constant 0 : index
    %2 = vector.load %arg2[%c0_2, %c0_3, %c0_4] : memref<3x8x4xf32, #tpu.memory_space<vmem>>, vector<1x8x4xf32>
    %3 = vector.shape_cast %2 : vector<1x8x4xf32> to vector<8x4xf32>
    %cst = arith.constant dense<0.000000e+00> : vector<8x16xf32>
    %4 = tpu.matmul %3, %1, %cst {dimension_numbers = #tpu.dot_dimension_numbers<[1], [0], [0], [1], [0, 0, 1, 1], [], []>} : vector<8x4xf32>, vector<4x16xf32>, vector<8x16xf32> -> vector<8x16xf32>
    %5 = vector.extract_strided_slice %4 {offsets = [0, 0], sizes = [8, 14], strides = [1, 1]} : vector<8x16xf32> to vector<8x14xf32>
    %c1 = arith.constant 1 : index
    %c0_5 = arith.constant 0 : index
    %c0_6 = arith.constant 0 : index
    %6 = vector.load %arg2[%c1, %c0_5, %c0_6] : memref<3x8x4xf32, #tpu.memory_space<vmem>>, vector<1x8x4xf32>
    %7 = vector.shape_cast %6 : vector<1x8x4xf32> to vector<8x4xf32>
    %cst_7 = arith.constant dense<0.000000e+00> : vector<8x16xf32>
    %8 = tpu.matmul %7, %1, %cst_7 {dimension_numbers = #tpu.dot_dimension_numbers<[1], [0], [0], [1], [0, 0, 1, 1], [], []>} : vector<8x4xf32>, vector<4x16xf32>, vector<8x16xf32> -> vector<8x16xf32>
    %9 = vector.extract_strided_slice %8 {offsets = [0, 1], sizes = [8, 14], strides = [1, 1]} : vector<8x16xf32> to vector<8x14xf32>
    %10 = arith.addf %5, %9 : vector<8x14xf32>
    %c2 = arith.constant 2 : index
    %c0_8 = arith.constant 0 : index
    %c0_9 = arith.constant 0 : index
    %11 = vector.load %arg2[%c2, %c0_8, %c0_9] : memref<3x8x4xf32, #tpu.memory_space<vmem>>, vector<1x8x4xf32>
    %12 = vector.shape_cast %11 : vector<1x8x4xf32> to vector<8x4xf32>
    %cst_10 = arith.constant dense<0.000000e+00> : vector<8x16xf32>
    %13 = tpu.matmul %12, %1, %cst_10 {dimension_numbers = #tpu.dot_dimension_numbers<[1], [0], [0], [1], [0, 0, 1, 1], [], []>} : vector<8x4xf32>, vector<4x16xf32>, vector<8x16xf32> -> vector<8x16xf32>
    %14 = vector.extract_strided_slice %13 {offsets = [0, 2], sizes = [8, 14], strides = [1, 1]} : vector<8x16xf32> to vector<8x14xf32>
    %15 = arith.addf %10, %14 : vector<8x14xf32>
    %cst_11 = arith.constant 0.00999999977 : f32
    %16 = vector.broadcast %cst_11 : f32 to vector<8x14xf32>
    %17 = arith.mulf %16, %15 : vector<8x14xf32>
    %18 = arith.maximumf %15, %17 : vector<8x14xf32>
    %c0_12 = arith.constant 0 : index
    %c0_13 = arith.constant 0 : index
    %c0_14 = arith.constant 0 : index
    %19 = vector.load %arg3[%c0_12, %c0_13, %c0_14] : memref<1x8x14xf32, #tpu.memory_space<vmem>>, vector<1x8x14xf32>
    %20 = vector.shape_cast %19 : vector<1x8x14xf32> to vector<8x14xf32>
    %21 = vector.shape_cast %18 : vector<8x14xf32> to vector<1x8x14xf32>
    tpu.vector_store %arg3[%c0_12, %c0_13, %c0_14], %21 {strides = array<i32>} : memref<1x8x14xf32, #tpu.memory_space<vmem>>, vector<1x8x14xf32>,
    return
  }
  func.func @transform_0(%arg0: i32) -> (i32, i32, i32) {
    %c0_i32 = arith.constant 0 : i32
    %c0_i32_0 = arith.constant 0 : i32
    %c0_i32_1 = arith.constant 0 : i32
    return %arg0, %c0_i32, %c0_i32_0 : i32, i32, i32
  }
  func.func @transform_1(%arg0: i32) -> (i32, i32, i32) {
    %c0_i32 = arith.constant 0 : i32
    %c0_i32_0 = arith.constant 0 : i32
    %c0_i32_1 = arith.constant 0 : i32
    %c0_i32_2 = arith.constant 0 : i32
    return %c0_i32, %c0_i32_0, %c0_i32_1 : i32, i32, i32
  }
  func.func @transform_2(%arg0: i32) -> (i32, i32, i32) {
    %c0_i32 = arith.constant 0 : i32
    %c0_i32_0 = arith.constant 0 : i32
    %c0_i32_1 = arith.constant 0 : i32
    return %arg0, %c0_i32, %c0_i32_0 : i32, i32, i32
  }
}

</mosaic_0001>

<bundles_post_ra>
// kernel: tpu_custom_call.1
= control target key start
LH: loop header
LB: loop body
LE: loop exit
PB: predicated region body
PF: predicated region fallthrough
CT: control target
= control target key end

     0   :  { %7 = vsyncpa [#allocation3], 0  ;;  %s731_s0 = inlined_call_operand.vmem [shape: f32[2,4,16], index: 0, kind: input, shape index: {}]   ;;  %s732_s1 = inlined_call_operand.vmem [shape: f32[3,8,4], index: 1, kind: input, shape index: {}]   ;;  %s733_s2 = inlined_call_operand.hbm [shape: f32[2,8,14], index: 2, kind: output, shape index: {}]  }
   0x1   :  { %9 = vsyncpa [#allocation3 + $0x1], 0  ;;  %s622_s9 = smov 0   ;;  %s624_s10 = smov 0  }
   0x2   :  { %s626_s11 = smov 0   ;;  %s628_s12 = smov 0  }
   0x3 LB: > { %s643_s13 = sadd.s32 4294967295, %s600_s12   ;;  %s456_s14 = sadd.s32 4294967294, %s600_s12   ;;  %s600_s12 = sphi %s628_s12, %s739_s12   ;;  %s596_s11 = sphi %s626_s11, %s738_s11   ;;  %s592_s10 = sphi %s624_s10, %s737_s10   ;;  %s588_s9 = sphi %s622_s9, %s736_s9  }
   0x4   : > { %s647_s15 = sadd.s32 1, %s600_s12   ;;  %s69_s16 = sadd.s32 1, %s596_s11 }
   0x5   : > { %s66_s17 = ssub.s32 %s600_s12, %s647_s15  ;;  %p79_p0 = scmp.ne.s32.totalorder %s596_s11, %s592_s10 }
   0x6   : > { %p67_p1 = scmp.eq.s32.totalorder %s66_s17, 0  ;;  %p80_p2 = scmp.eq.s32.totalorder %s643_s13, 1 }
   0x7   : > { %p85_p3 = scmp.ne.s32.totalorder %s592_s10, %s588_s9  ;;  %p86_p4 = scmp.eq.s32.totalorder %s456_s14, 1 }
   0x8   : > { %s658_s18 = scalar_select %p67_p1, %s596_s11, %s69_s16  }
   0x9   : > { %p660_p5 = por %p80_p2, %p79_p0  ;;  %p664_p6 = por %p86_p4, %p85_p3 }
   0xa   : > { %p459_p7 = scmp.ge.s32.totalorder %s600_s12, 1  ;;  %p114_p8 = scmp.lt.s32.totalorder %s600_s12, 3 }
   0xc   : > { %p115_p9 = pnand %p459_p7, %p114_p8 }
   0xd   : > { %p135_p10 = scmp.lt.s32.totalorder (!%p115_p9), %s643_s13, 1  ;;  %v602_v0 = vmov (!%p115_p9), 0.0   ;;  %vm603_vm0 = vmmov (!%p115_p9), 0   ;;  %vm145_vm1 = vcmask (!%p115_p9), 1043456   ;;  %v140_v1 = vld [vmem:[%s732_s1] sm:$0xff] (!%p115_p9)  ;;  %vm141_vm2 = vcmask (!%p115_p9), 31744  }
   0xe   : > { %118 = sbr.rel (%p115_p9) target bundleno = 378 (0x17a), region = 28  ;;  %480 = vmatprep.subr.mxu0 (!%p115_p9), %v602_v0  ;;  %485 = vmatprep.subr.mxu1 (!%p115_p9), %v602_v0  ;;  %v464_v2 = vld [vmem:[%s732_s1 + $0x8] sm:$0xff] (!%p115_p9)  ;;  %v467_v4 = vld [vmem:[%s732_s1 + $0x10] sm:$0xff] (!%p115_p9)  ;;  %s604_s4 = smov (!%p115_p9), 127   ;;  %vm381_vm3 = vcmask (!%p115_p9), 113664  }
   0xf   : > { %482 = vmatprep.mubr.msk.f32.mxu0 (!%p115_p9), %vm603_vm0, %v602_v0  ;;  %487 = vmatprep.mubr.msk.f32.mxu1 (!%p115_p9), %vm603_vm0, %v602_v0  ;;  %s605_s5 = smov (!%p115_p9), 126   ;;  %s132_s6 = sand.u32 (!%p115_p9), 1, %s592_s10  }
  0x10   : > { %s460_s7 = sshll.u32 (!%p115_p9), %s132_s6, 3  ;;  %s471_s8 = sshll.u32 (!%p115_p9), %s643_s13, 7 }
  0x11   : > { %s134_s14 = scalar_lea.vmem (!%p115_p9), [#allocation2], %s460_s7  ;;  %s384_s23 = scalar_lea.sflag (!%p115_p9), [#allocation3], %s132_s6 }
  0x12   : > { %s397_s16 = sshll.u32 (!%p115_p9), %s134_s14, 4  ;;  %s691_s16 = int_to_ptr.vmem [resolvable:$true] %s397_s16 }
  0x13   : > { %s538_s24 = scalar_lea.vmem (!%p115_p9), %s691_s16, 128 }
  0x14   : > { %p539_p11 = scmp.ne.s32.totalorder (!%p115_p9), %s691_s16, %s538_s24 }
  0x15   : > { %s136_s21 = scalar_select %p135_p10, %s643_s13, 1 }
  0x16   : > { %p540_p12 = pnand %p539_p11, %p660_p5  ;;  %s606_s13 = smov [#allocation2]  }
  0x17   : > { %s461_s22 = sshll.u32 %s136_s21, 2 }
  0x18   : > { %s138_s25 = scalar_lea.vmem %s731_s0, %s461_s22  ;;  %s689_s22 = scalar_lea.hbm %s733_s2, %s471_s8 }
  0x19   : > { %v139_v3 = vld [vmem:[%s138_s25] sm:$0xf]  ;;  %p541_p13 = pneg %p540_p12  ;;  %s542_s25 = sshll.u32 %s606_s13, 4  ;;  %s543_s25 = int_to_ptr.vmem [resolvable:$false] %s542_s25 }
  0x1a   : > { %481 = vmatpush3.msk.msra.mxu0 %vm145_vm1, %v139_v3  ;;  %486 = vmatpush3.msk.msra.mxu1 %vm145_vm1, %v139_v3  ;;  %s544_s26 = scalar_lea.vmem %s543_s25, 256  ;;  %p545_p0 = scmp.lt.s32.totalorder %s691_s16, %s543_s25 }
  0x1b   : > { %483 = vmatmul.mubr.msk.f32.vlgmr.msra.gmra.mrb[0].mxu0 %vm141_vm2, %v140_v1  ;;  %488 = vmatmul.mubr.msk.f32.vlgmr.msra.gmra.mrb[0].mxu1 %vm141_vm2, %v464_v2  ;;  %p546_p1 = scmp.lt.s32.totalorder %s544_s26, %s538_s24 }
  0x1c   : > { %490 = vmatprep.subr.mxu0 %v602_v0  ;;  %492 = vmatprep.mubr.msk.f32.mxu0 %vm603_vm0, %v602_v0 }
  0x1d   : > { %491 = vmatpush3.msk.msra.mxu0 %vm145_vm1, %v139_v3  ;;  %p547_p2 = por %p546_p1, %p545_p0 }
  0x1f   : > { %493 = vmatmul.mubr.msk.f32.vlgmr.msra.gmra.mrb[2].mxu0 %vm141_vm2, %v467_v4  ;;  %p548_p3 = pnand %p547_p2, %p541_p13 }
  0xee   : > { %v215_v5 = vpop.f32.mrb[0].mxu0  ;;  %v290_v6 = vpop.f32.mrb[0].mxu1 }
  0xef   : > { %295 = vrot.lane.b32.xlu0 %v290_v6, %s604_s4  ;;  %v484_v7 = vpop.f32.mrb[1].mxu0  ;;  %v489_v8 = vpop.f32.mrb[1].mxu1 }
  0xf2   : > { %v370_v9 = vpop.f32.mrb[2].mxu0 }
  0xf3   : > { %375 = vrot.lane.b32.xlu0 %v370_v9, %s605_s5  ;;  %v494_v10 = vpop.f32.mrb[3].mxu0 }
 0x161   : > { %v296_v11 = vpop.permute.xlu0 %295 }
 0x162   : > { %v298_v12 = vadd.f32 %v296_v11, %v215_v5 }
 0x165   : > { %v376_v13 = vpop.permute.xlu0 %375 }
 0x166   : > { %v378_v14 = vadd.f32 %v376_v13, %v298_v12 }
 0x168   : > { %v379_v15 = vmul.f32 0.01, %v378_v14 }
 0x16a   : > { %v380_v16 = vmax.f32 %v378_v14, %v379_v15 }
 0x16c   : > { %382 = vst.msk [vmem:[%s134_s14] sm:$0xff] %vm381_vm3, %v380_v16 }
 0x16d   : > { %551 = shalt.err (!%p548_p3)
}
 0x16e   : > { %s552_s27 = scalar_lea.hbm %s689_s22, 128  ;;  %s556_s30 = scalar_lea.hbm %s733_s2, 256 }
 0x16f   : > { %p553_p4 = scmp.ne.s32.totalorder %s689_s22, %s552_s27  ;;  %p557_p9 = scmp.lt.u32.totalorder %s689_s22, %s733_s2 }
 0x170   : > { %p558_p10 = scmp.lt.u32.totalorder %s556_s30, %s552_s27  ;;  %p560_p12 = scmp.lt.u32.totalorder %s552_s27, %s689_s22 }
 0x171   : > { %p554_p7 = pnand %p553_p4, %p660_p5 }
 0x172   : > { %p559_p11 = por %p558_p10, %p557_p9 }
 0x173   : > { %p555_p8 = pneg %p554_p7 }
 0x174   : > { %p561_p13 = por %p560_p12, %p559_p11 }
 0x176   : > { %p562_p0 = pnand %p561_p13, %p555_p8 }
 0x178   : > { %565 = shalt.err (!%p562_p0)
}
 0x179   : > { %495 = dma.vmem_to_hbm [thread:$0]  (%p660_p5), %s691_s16, 128, %s689_s22, %s384_s23  }
 0x17a PF: > { %p501_p1 = scmp.ge.s32.totalorder %s600_s12, 2  ;;  %s409_s5 = sand.u32 1, %s588_s9  }
 0x17b   : > { %s410_s6 = scalar_lea.sflag [#allocation3], %s409_s5 }
 0x17c   : > { %p498_p2 = pnand %p501_p1, %p664_p6 }
 0x17e   : > { %583 = dma.done.wait (!%p498_p2), %s410_s6, 128  }
 0x17f   : > { %585 = vsyncadd (!%p498_p2), %s410_s6, 4294967168  ;;  %p12_p3 = scmp.ge.s32.totalorder %s647_s15, 4   ;;  %s736_s9 = smov %s592_s10 }
 0x180   : > { %s737_s10 = smov %s596_s11  ;;  %s738_s11 = smov %s658_s18 }
 0x181   : > { %s739_s12 = smov %s647_s15  ;;  %14 = sbr.rel (!%p12_p3) target bundleno = 3 (0x3), region = 65 }
 0x188   :  { %415 = vsyncpa [#allocation3], 1 }
 0x189   :  { %417 = vsyncpa [#allocation3 + $0x1], 1 }

</bundles_post_ra>
